<compile_context>
chip_gen: v6e
topology: v6e:2x2x1
jax: 0.10.0
libtpu: 0.0.40
codegen_flags: <defaults>
</compile_context>

<pallas_src>
import functools

import jax
import jax.numpy as jnp
from jax import lax
from jax.experimental import pallas as pl
from jax.experimental.pallas import tpu as pltpu


def _ce_kernel(inv_n, logits_ref, tgt_ref, out_ref, acc_ref):
    """One grid step = (task-tile, batch-tile). Accumulates per-task CE sums in VMEM
    scratch; writes the per-task mean once on the last batch step."""
    b = pl.program_id(1)

    @pl.when(b == 0)
    def _():
        acc_ref[...] = jnp.zeros_like(acc_ref)

    logits = logits_ref[...].astype(jnp.float32)      # (TT, TN, C) -- f32 in VMEM only
    tgt = tgt_ref[...]                                # (TT, TN, 1) int32, batch on sublanes

    # Numerically stable log-sum-exp over the class (lane) axis.
    m = jnp.max(logits, axis=-1, keepdims=True)                                   # (TT, TN, 1)
    lse = m + jnp.log(jnp.sum(jnp.exp(logits - m), axis=-1, keepdims=True))       # (TT, TN, 1)

    # Gather the target-class logit via iota/one-hot select (broadcast along lanes).
    cls_ids = lax.broadcasted_iota(jnp.int32, logits.shape, 2)                    # (TT, TN, C)
    picked = jnp.sum(jnp.where(cls_ids == tgt, logits, 0.0), axis=-1, keepdims=True)

    # Per-task partial sum over this batch tile.
    acc_ref[...] += jnp.sum(lse - picked, axis=1, keepdims=True)                  # (TT, 1, 1)

    @pl.when(b == pl.num_programs(1) - 1)
    def _():
        out_ref[...] = acc_ref[...] * inv_n           # per-task mean CE


def _pick_tiles(T, N, C, itemsize, budget_bytes):
    """Choose (task_tile, batch_tile).  Collapse everything into one grid step when the
    whole slab fits the budget; otherwise one task per step with a batch tile that is a
    multiple of 8 (or the full batch)."""
    if T * N * C * itemsize <= budget_bytes:
        return T, N                                   # single grid step
    if N * C * itemsize <= budget_bytes:
        return 1, N                                   # one task per step, whole batch
    max_rows = max(8, (budget_bytes // (C * itemsize)) // 8 * 8)
    d = min(max_rows, (N // 8) * 8)
    while d >= 8:
        if N % d == 0:
            return 1, d                               # largest mult-of-8 divisor that fits
        d -= 8
    return 1, N                                       # fallback: whole batch (raise VMEM limit)


def multi_task_loss_stacked(logits, targets):
    """logits: (T, N, C) float (bf16/f16/f32 -- kept in native dtype).
    targets: (T, N) integer class indices.
    Returns scalar float32 = sum_t mean_n CE(logits[t], targets[t])  (PyTorch semantics)."""
    T, N, C = logits.shape
    targets = targets.astype(jnp.int32).reshape(T, N, 1)      # batch on sublanes

    itemsize = jnp.dtype(logits.dtype).itemsize
    budget = 8 * 1024 * 1024                                  # per logits block (fits all gens)
    tt, tn = _pick_tiles(T, N, C, itemsize, budget)
    grid = (T // tt, N // tn)

    block_bytes = tt * tn * C * itemsize + tt * tn * 4
    vmem_limit = int(min(100 << 20, max(32 << 20, 4 * block_bytes)))

    kernel = functools.partial(_ce_kernel, 1.0 / N)

    per_task = pl.pallas_call(
        kernel,
        out_shape=jax.ShapeDtypeStruct((T, 1, 1), jnp.float32),
        grid_spec=pltpu.PrefetchScalarGridSpec(
            num_scalar_prefetch=0,
            grid=grid,
            in_specs=[
                pl.BlockSpec((tt, tn, C), lambda t, b: (t, b, 0)),
                pl.BlockSpec((tt, tn, 1), lambda t, b: (t, b, 0)),
            ],
            out_specs=pl.BlockSpec((tt, 1, 1), lambda t, b: (t, 0, 0)),
            scratch_shapes=[pltpu.VMEM((tt, 1, 1), jnp.float32)],
        ),
        compiler_params=pltpu.CompilerParams(
            dimension_semantics=("parallel", "arbitrary"),
            vmem_limit_bytes=vmem_limit,
        ),
    )(logits, targets)

    return jnp.sum(per_task)                                  # trivial T-element reduce


def multi_task_loss(outputs, targets):
    """List-of-arrays convenience wrapper matching the torch module's signature.
    Stacks in the NATIVE dtype (no f32 copy); pass pre-stacked arrays to
    multi_task_loss_stacked to avoid even this layout copy."""
    logits = jnp.stack(outputs, axis=0)
    tgts = jnp.stack(targets, axis=0)
    return multi_task_loss_stacked(logits, tgts)


def _reference_loss(outputs, targets):
    """Pure-JAX reference matching torch.nn.CrossEntropyLoss (mean reduction)."""
    total = jnp.float32(0.0)
    for o, t in zip(outputs, targets):
        o = o.astype(jnp.float32)
        lse = jax.scipy.special.logsumexp(o, axis=-1)
        picked = jnp.take_along_axis(o, t[:, None].astype(jnp.int32), axis=-1)[:, 0]
        total = total + jnp.mean(lse - picked)
    return total


if __name__ == "__main__":
    num_tasks = 3
    batch = 8
    num_classes = 32

    key = jax.random.PRNGKey(0)
    keys = jax.random.split(key, 2 * num_tasks)
    outputs = [
        jax.random.normal(keys[2 * i], (batch, num_classes), dtype=jnp.float32)
        for i in range(num_tasks)
    ]
    targets = [
        jax.random.randint(keys[2 * i + 1], (batch,), 0, num_classes, dtype=jnp.int32)
        for i in range(num_tasks)
    ]

    loss = multi_task_loss(outputs, targets)
    loss = jax.block_until_ready(loss)

    ref = jax.block_until_ready(_reference_loss(outputs, targets))
    assert jnp.allclose(loss, ref, rtol=1e-5, atol=1e-5), (loss, ref)

    print("KERNEL_OK")
</pallas_src>

<mosaic_0001>
module attributes {stable_mosaic.version = 11 : i64} {
  func.func @_ce_kernel(%arg0: i32, %arg1: i32, %arg2: memref<3x8x32xf32, #tpu.memory_space<vmem>>, %arg3: memref<3x8x1xi32, #tpu.memory_space<vmem>>, %arg4: memref<3x1x1xf32, #tpu.memory_space<vmem>>, %arg5: memref<3x1x1xf32, #tpu.memory_space<vmem>>) attributes {dimension_semantics = [#tpu.dimension_semantics<parallel>, #tpu.dimension_semantics<arbitrary>], iteration_bounds = array<i64: 1, 1>, scalar_prefetch = 0 : i64, scratch_operands = 1 : i64, tpu.core_type = #tpu.core_type<tc>, window_params = [{transform_indices = @transform_0, window_bounds = array<i64: 3, 8, 32>}, {transform_indices = @transform_1, window_bounds = array<i64: 3, 8, 1>}, {transform_indices = @transform_2, window_bounds = array<i64: 3, 1, 1>}]} {
    %c0_i32 = arith.constant 0 : i32
    %0 = arith.cmpi eq, %arg1, %c0_i32 : i32
    %1 = arith.extui %0 : i1 to i32
    %c0_i32_0 = arith.constant 0 : i32
    %2 = arith.cmpi ne, %1, %c0_i32_0 : i32
    scf.if %2 {
      %cst_18 = arith.constant 0.000000e+00 : f32
      %30 = vector.broadcast %cst_18 : f32 to vector<3x1x1xf32>
      %c0_19 = arith.constant 0 : index
      %c0_20 = arith.constant 0 : index
      %c0_21 = arith.constant 0 : index
      %31 = vector.load %arg5[%c0_19, %c0_20, %c0_21] : memref<3x1x1xf32, #tpu.memory_space<vmem>>, vector<3x1x1xf32>
      tpu.vector_store %arg5[%c0_19, %c0_20, %c0_21], %30 {strides = array<i32>} : memref<3x1x1xf32, #tpu.memory_space<vmem>>, vector<3x1x1xf32>,
    } else {
    }
    %c0 = arith.constant 0 : index
    %c0_1 = arith.constant 0 : index
    %c0_2 = arith.constant 0 : index
    %3 = vector.load %arg2[%c0, %c0_1, %c0_2] : memref<3x8x32xf32, #tpu.memory_space<vmem>>, vector<3x8x32xf32>
    %c0_3 = arith.constant 0 : index
    %c0_4 = arith.constant 0 : index
    %c0_5 = arith.constant 0 : index
    %4 = vector.load %arg3[%c0_3, %c0_4, %c0_5] : memref<3x8x1xi32, #tpu.memory_space<vmem>>, vector<3x8x1xi32>
    %cst = arith.constant dense<0xFF800000> : vector<3x8xf32>
    %5 = vector.multi_reduction <maximumf>, %3, %cst [2] : vector<3x8x32xf32> to vector<3x8xf32>
    %6 = vector.shape_cast %5 : vector<3x8xf32> to vector<3x8x1xf32>
    %7 = vector.broadcast %6 : vector<3x8x1xf32> to vector<3x8x32xf32>
    %8 = arith.subf %3, %7 : vector<3x8x32xf32>
    %9 = math.exp %8 : vector<3x8x32xf32>
    %cst_6 = arith.constant dense<0.000000e+00> : vector<3x8xf32>
    %10 = vector.multi_reduction <add>, %9, %cst_6 [2] : vector<3x8x32xf32> to vector<3x8xf32>
    %11 = vector.shape_cast %10 : vector<3x8xf32> to vector<3x8x1xf32>
    %12 = math.log %11 : vector<3x8x1xf32>
    %13 = arith.addf %6, %12 : vector<3x8x1xf32>
    %14 = tpu.iota {dimensions = array<i32: 2>} : vector<3x8x32xi32>
    %15 = vector.broadcast %4 : vector<3x8x1xi32> to vector<3x8x32xi32>
    %16 = arith.cmpi eq, %14, %15 : vector<3x8x32xi32>
    %cst_7 = arith.constant 0.000000e+00 : f32
    %17 = vector.broadcast %cst_7 : f32 to vector<3x8x32xf32>
    %18 = arith.select %16, %3, %17 : vector<3x8x32xi1>, vector<3x8x32xf32>
    %cst_8 = arith.constant dense<0.000000e+00> : vector<3x8xf32>
    %19 = vector.multi_reduction <add>, %18, %cst_8 [2] : vector<3x8x32xf32> to vector<3x8xf32>
    %20 = vector.shape_cast %19 : vector<3x8xf32> to vector<3x8x1xf32>
    %c0_9 = arith.constant 0 : index
    %c0_10 = arith.constant 0 : index
    %c0_11 = arith.constant 0 : index
    %21 = vector.load %arg5[%c0_9, %c0_10, %c0_11] : memref<3x1x1xf32, #tpu.memory_space<vmem>>, vector<3x1x1xf32>
    %22 = arith.subf %13, %20 : vector<3x8x1xf32>
    %cst_12 = arith.constant dense<0.000000e+00> : vector<3x1xf32>
    %23 = vector.multi_reduction <add>, %22, %cst_12 [1] : vector<3x8x1xf32> to vector<3x1xf32>
    %24 = vector.shape_cast %23 : vector<3x1xf32> to vector<3x1x1xf32>
    %25 = arith.addf %21, %24 : vector<3x1x1xf32>
    %c0_13 = arith.constant 0 : index
    %c0_14 = arith.constant 0 : index
    %c0_15 = arith.constant 0 : index
    %26 = vector.load %arg5[%c0_13, %c0_14, %c0_15] : memref<3x1x1xf32, #tpu.memory_space<vmem>>, vector<3x1x1xf32>
    tpu.vector_store %arg5[%c0_13, %c0_14, %c0_15], %25 {strides = array<i32>} : memref<3x1x1xf32, #tpu.memory_space<vmem>>, vector<3x1x1xf32>,
    %c0_i32_16 = arith.constant 0 : i32
    %27 = arith.cmpi eq, %arg1, %c0_i32_16 : i32
    %28 = arith.extui %27 : i1 to i32
    %c0_i32_17 = arith.constant 0 : i32
    %29 = arith.cmpi ne, %28, %c0_i32_17 : i32
    scf.if %29 {
      %c0_18 = arith.constant 0 : index
      %c0_19 = arith.constant 0 : index
      %c0_20 = arith.constant 0 : index
      %30 = vector.load %arg5[%c0_18, %c0_19, %c0_20] : memref<3x1x1xf32, #tpu.memory_space<vmem>>, vector<3x1x1xf32>
      %cst_21 = arith.constant 1.250000e-01 : f32
      %31 = vector.broadcast %cst_21 : f32 to vector<3x1x1xf32>
      %32 = arith.mulf %30, %31 : vector<3x1x1xf32>
      %c0_22 = arith.constant 0 : index
      %c0_23 = arith.constant 0 : index
      %c0_24 = arith.constant 0 : index
      %33 = vector.load %arg4[%c0_22, %c0_23, %c0_24] : memref<3x1x1xf32, #tpu.memory_space<vmem>>, vector<3x1x1xf32>
      tpu.vector_store %arg4[%c0_22, %c0_23, %c0_24], %32 {strides = array<i32>} : memref<3x1x1xf32, #tpu.memory_space<vmem>>, vector<3x1x1xf32>,
    } else {
    }
    return
  }
  func.func @transform_0(%arg0: i32, %arg1: i32) -> (i32, i32, i32) {
    %c0_i32 = arith.constant 0 : i32
    %c0_i32_0 = arith.constant 0 : i32
    return %arg0, %arg1, %c0_i32 : i32, i32, i32
  }
  func.func @transform_1(%arg0: i32, %arg1: i32) -> (i32, i32, i32) {
    %c0_i32 = arith.constant 0 : i32
    %c0_i32_0 = arith.constant 0 : i32
    return %arg0, %arg1, %c0_i32 : i32, i32, i32
  }
  func.func @transform_2(%arg0: i32, %arg1: i32) -> (i32, i32, i32) {
    %c0_i32 = arith.constant 0 : i32
    %c0_i32_0 = arith.constant 0 : i32
    %c0_i32_1 = arith.constant 0 : i32
    return %arg0, %c0_i32, %c0_i32_0 : i32, i32, i32
  }
}

</mosaic_0001>

<bundles_post_ra>
// kernel: tpu_custom_call.1
= control target key start
LH: loop header
LB: loop body
LE: loop exit
PB: predicated region body
PF: predicated region fallthrough
CT: control target
= control target key end

     0   :  { %vm25_vm0 = vcmask 261120   ;;  %v151_v3 = vmov 0   ;;  %v62_v19 = vlaneseq  ;;  %vm15_vm4 = vcmask 0   ;;  %s213_s0 = inlined_call_operand.vmem [shape: f32[3,8,32], index: 0, kind: input, shape index: {}]   ;;  %s214_s1 = inlined_call_operand.vmem [shape: s32[3,8,1], index: 1, kind: input, shape index: {}]   ;;  %s215_s2 = inlined_call_operand.vmem [shape: f32[3,1,1], index: 2, kind: output, shape index: {}]  }
   0x1   :  { %v19_v0 = vld [vmem:[%s213_s0] sm:$0xff]  ;;  %v21_v1 = vld [vmem:[%s213_s0 + $0x10] sm:$0xff]  ;;  %v20_v2 = vld [vmem:[%s213_s0 + $0x8] sm:$0xff]  ;;  %137 = vset.pattern.permute.xlu1 %v151_v3  ;;  %138 = vset.pattern.permute.xlu0 %v151_v3  ;;  %v152_v36 = vmov 0.0  }
   0x2   :  { %v26_v4 = vsel %vm25_vm0, %v19_v0, -inf  ;;  %v32_v5 = vsel %vm25_vm0, %v21_v1, -inf  ;;  %v29_v6 = vsel %vm25_vm0, %v20_v2, -inf  ;;  %v22_v7 = vld [vmem:[%s214_s1] sm:$0xff]  ;;  %v24_v8 = vld [vmem:[%s214_s1 + $0x10] sm:$0xff]  ;;  %v23_v9 = vld [vmem:[%s214_s1 + $0x8] sm:$0xff] }
   0x3   :  { %27 = vmax.xlane.f32.xlu0 %v26_v4  ;;  %33 = vmax.xlane.f32.xlu1 %v32_v5  ;;  %v63_v20 = vand.u32 127, %v62_v19  ;;  %16 = vst.msk [vmem:[#allocation2] sm:$0x1] %vm15_vm4, %v152_v36  ;;  %17 = vst.msk [vmem:[#allocation2 + $0x1] sm:$0x1] %vm15_vm4, %v152_v36 }
   0x4   :  { %18 = vst.msk [vmem:[#allocation2 + $0x2] sm:$0x1] %vm15_vm4, %v152_v36 }
   0x7   :  { %30 = vmax.xlane.f32.xlu0 %v29_v6 }
  0x14   :  { %65 = vperm.xlu1 %137, %v22_v7  }
  0x18   :  { %71 = vperm.xlu1 %137, %v24_v8  }
  0x1d   :  { %68 = vperm.xlu0 %138, %v23_v9   ;;  %v90_v9 = vld [vmem:[#allocation2 + $0x2] sm:$0x1] }
  0x8c   :  { %v28_v10 = vpop.xlane.xlu0 %27  ;;  %v34_v11 = vpop.xlane.xlu1 %33 }
  0x8d   :  { %v35_v12 = vsub.f32 %v19_v0, %v28_v10  ;;  %v37_v13 = vsub.f32 %v21_v1, %v34_v11 }
  0x8f   :  { %v38_v14 = vmul.f32 1.442695, %v35_v12  ;;  %v42_v15 = vmul.f32 1.442695, %v37_v13 }
  0x90   :  { %v31_v16 = vpop.xlane.xlu0 %30  ;;  %v66_v21 = vpop.permute.xlu1 %65 }
  0x91   :  { %139 = vpow2.f32 %v38_v14  ;;  %v36_v17 = vsub.f32 %v20_v2, %v31_v16  ;;  %vm73_vm1 = vcmp.eq.s32.totalorder %v63_v20, %v66_v21 }
  0x92   :  { %141 = vpow2.f32 %v42_v15  ;;  %v76_v28 = vsel %vm73_vm1, %v19_v0, 0.0 }
  0x93   :  { %v40_v18 = vmul.f32 1.442695, %v36_v17  ;;  %v79_v30 = vsel %vm25_vm0, %v76_v28, 0.0 }
  0x94   :  { %v72_v31 = vpop.permute.xlu1 %71 }
  0x95   :  { %143 = vpow2.f32 %v40_v18  ;;  %vm75_vm3 = vcmp.eq.s32.totalorder %v63_v20, %v72_v31 }
  0x96   :  { %v78_v34 = vsel %vm75_vm3, %v21_v1, 0.0  ;;  %v88_v1 = vld [vmem:[#allocation2] sm:$0x1] }
  0x97   :  { %v85_v35 = vsel %vm25_vm0, %v78_v34, 0.0 }
  0x98   :  { %v69_v25 = vpop.permute.xlu0 %68 }
  0x99   :  { %vm74_vm2 = vcmp.eq.s32.totalorder %v63_v20, %v69_v25 }
  0x9a   :  { %v77_v32 = vsel %vm74_vm2, %v20_v2, 0.0 }
  0x9b   :  { %v82_v33 = vsel %vm25_vm0, %v77_v32, 0.0 }
  0x9e   :  { %v140_v22 = vpop.eup %139 }
  0x9f   :  { %v142_v23 = vpop.eup %141  ;;  %v44_v24 = vsel %vm25_vm0, %v140_v22, 0.0 }
  0xa0   :  { %45 = vadd.xlane.f32.xlu1 %v44_v24  ;;  %v50_v26 = vsel %vm25_vm0, %v142_v23, 0.0 }
  0xa2   :  { %v144_v27 = vpop.eup %143 }
  0xa3   :  { %v47_v29 = vsel %vm25_vm0, %v144_v27, 0.0 }
  0xa4   :  { %51 = vadd.xlane.f32.xlu1 %v50_v26  ;;  %48 = vadd.xlane.f32.xlu0 %v47_v29 }
  0xa8   :  { %80 = vadd.xlane.f32.xlu1 %v79_v30 }
  0xac   :  { %83 = vadd.xlane.f32.xlu1 %v82_v33 }
  0xb0   :  { %86 = vadd.xlane.f32.xlu1 %v85_v35 }
 0x129   :  { %v46_v37 = vpop.xlane.xlu1 %45 }
 0x12a   :  { %145 = vlog2.f32 %v46_v37 }
 0x12d   :  { %v52_v38 = vpop.xlane.xlu1 %51  ;;  %v49_v39 = vpop.xlane.xlu0 %48 }
 0x12e   :  { %147 = vlog2.f32 %v52_v38 }
 0x12f   :  { %149 = vlog2.f32 %v49_v39 }
 0x131   :  { %v81_v40 = vpop.xlane.xlu1 %80 }
 0x135   :  { %v84_v43 = vpop.xlane.xlu1 %83 }
 0x137   :  { %v146_v41 = vpop.eup %145 }
 0x138   :  { %v54_v42 = vmul.f32 0.6931472, %v146_v41 }
 0x139   :  { %v87_v53 = vpop.xlane.xlu1 %86 }
 0x13a   :  { %v59_v44 = vadd.f32 %v54_v42, %v28_v10  ;;  %v89_v10 = vld [vmem:[#allocation2 + $0x1] sm:$0x1] }
 0x13b   :  { %v148_v45 = vpop.eup %147 }
 0x13c   :  { %v150_v46 = vpop.eup %149  ;;  %v58_v47 = vmul.f32 0.6931472, %v148_v45  ;;  %v91_v48 = vsub.f32 %v59_v44, %v81_v40 }
 0x13d   :  { %v56_v49 = vmul.f32 0.6931472, %v150_v46 }
 0x13e   :  { %v94_v50 = vrot.slane %v91_v48, 4  ;;  %v61_v51 = vadd.f32 %v58_v47, %v34_v11 }
 0x13f   :  { %v60_v52 = vadd.f32 %v56_v49, %v31_v16 }
 0x140   :  { %v95_v54 = vadd.f32 %v94_v50, %v91_v48  ;;  %v93_v55 = vsub.f32 %v61_v51, %v87_v53 }
 0x141   :  { %v92_v56 = vsub.f32 %v60_v52, %v84_v43 }
 0x142   :  { %v96_v57 = vrot.slane %v95_v54, 2  ;;  %v106_v58 = vrot.slane %v93_v55, 4 }
 0x143   :  { %v100_v59 = vrot.slane %v92_v56, 4 }
 0x144   :  { %v97_v60 = vadd.f32 %v96_v57, %v95_v54  ;;  %v107_v61 = vadd.f32 %v106_v58, %v93_v55 }
 0x145   :  { %v101_v62 = vadd.f32 %v100_v59, %v92_v56 }
 0x146   :  { %v98_v63 = vrot.slane %v97_v60, 1  ;;  %v108_v0 = vrot.slane %v107_v61, 2 }
 0x147   :  { %v102_v2 = vrot.slane %v101_v62, 2 }
 0x148   :  { %v99_v3 = vadd.f32 %v98_v63, %v97_v60  ;;  %v109_v4 = vadd.f32 %v108_v0, %v107_v61 }
 0x149   :  { %v103_v5 = vadd.f32 %v102_v2, %v101_v62 }
 0x14a   :  { %v112_v6 = vadd.f32 %v99_v3, %v88_v1  ;;  %v110_v7 = vrot.slane %v109_v4, 1 }
 0x14b   :  { %v104_v8 = vrot.slane %v103_v5, 1 }
 0x14c   :  { %116 = vst.msk [vmem:[#allocation2] sm:$0x1] %vm15_vm4, %v112_v6  ;;  %v111_v11 = vadd.f32 %v110_v7, %v109_v4 }
 0x14d   :  { %v105_v12 = vadd.f32 %v104_v8, %v103_v5 }
 0x14e   :  { %v114_v13 = vadd.f32 %v111_v11, %v90_v9 }
 0x14f   :  { %v113_v14 = vadd.f32 %v105_v12, %v89_v10 }
 0x150   :  { %118 = vst.msk [vmem:[#allocation2 + $0x2] sm:$0x1] %vm15_vm4, %v114_v13 }
 0x151   :  { %117 = vst.msk [vmem:[#allocation2 + $0x1] sm:$0x1] %vm15_vm4, %v113_v14 }
 0x153   :  { %v122_v15 = vld [vmem:[#allocation2] sm:$0x1] }
 0x154   :  { %v125_v16 = vmul.f32 0.125, %v122_v15 }
 0x156   :  { %128 = vst.msk [vmem:[%s215_s2] sm:$0x1] %vm15_vm4, %v125_v16 }
 0x157   :  { %v124_v17 = vld [vmem:[#allocation2 + $0x2] sm:$0x1] }
 0x158   :  { %v123_v18 = vld [vmem:[#allocation2 + $0x1] sm:$0x1]  ;;  %v127_v19 = vmul.f32 0.125, %v124_v17 }
 0x159   :  { %v126_v20 = vmul.f32 0.125, %v123_v18 }
 0x15a   :  { %130 = vst.msk [vmem:[%s215_s2 + $0x2] sm:$0x1] %vm15_vm4, %v127_v19 }
 0x15b   :  { %129 = vst.msk [vmem:[%s215_s2 + $0x1] sm:$0x1] %vm15_vm4, %v126_v20 }

</bundles_post_ra>
